<compile_context>
chip_gen: v6e
topology: v6e:2x2x1
jax: 0.10.0
libtpu: 0.0.40
codegen_flags: <defaults>
</compile_context>

<pallas_src>
import jax
import jax.numpy as jnp
from jax.experimental import pallas as pl
from jax.experimental.pallas import tpu as pltpu

BN_EPS = 1e-5


# ---------------------------------------------------------------------------
# In-kernel helpers
# ---------------------------------------------------------------------------

def _bn_sigmoid(h, gamma, beta):
    """BatchNorm1d (training-mode batch stats, biased variance) + sigmoid.
    The batch is the sublane axis, so statistics are plain axis-0 reductions."""
    mu = jnp.mean(h, axis=0, keepdims=True)
    d = h - mu
    var = jnp.mean(d * d, axis=0, keepdims=True)
    return jax.nn.sigmoid(d * jax.lax.rsqrt(var + BN_EPS) * gamma + beta)


# ---------------------------------------------------------------------------
# Fused kernel: all node nets + node-mean + combine_net_irs + combine_net_bs
# ---------------------------------------------------------------------------

def _initial_layer_kernel(
    x_ref, mres_ref,
    nw1, nb1, ng1, nbt1, nw2, nb2, ng2, nbt2,     # block-diagonal per-node Net
    tw1, tb1, tg1, tbt1, tw2, tb2, tg2, tbt2,     # fused combine_net_irs | combine_net_bs
    out_ref,
):
    x = x_ref[...]                                             # (B, Nn*in)

    # All number_nodes Net applications as two block-diagonal matmuls; batch stays
    # on the sublane axis, features are lane-dense.
    h = jnp.dot(x, nw1[...], preferred_element_type=jnp.float32) + nb1[...]
    h = _bn_sigmoid(h, ng1[...], nbt1[...])                    # (B, Nn*hid)
    o = jnp.dot(h, nw2[...], preferred_element_type=jnp.float32) + nb2[...]
    nodes = _bn_sigmoid(o, ng2[...], nbt2[...])                # (B, Nn*out)

    # result[b, :] = mean over nodes (tile-averaging matmul keeps everything 2-D).
    result = jnp.dot(nodes, mres_ref[...], preferred_element_type=jnp.float32)  # (B, out)

    # combine_net_irs | combine_net_bs fused side by side (columns never mix, so the
    # per-column BN is exactly each net's own BatchNorm).
    ht = jnp.dot(result, tw1[...], preferred_element_type=jnp.float32) + tb1[...]
    ht = _bn_sigmoid(ht, tg1[...], tbt1[...])                  # (B, 2*hid)
    ot = jnp.dot(ht, tw2[...], preferred_element_type=jnp.float32) + tb2[...]
    tail = _bn_sigmoid(ot, tg2[...], tbt2[...])                # (B, 2*out)  [irs | bs]

    n_cols = nodes.shape[1]
    out_ref[:, :n_cols] = nodes                                # node slots 0 .. Nn-1
    out_ref[:, n_cols:] = tail                                 # slot -2 (irs), slot -1 (bs)


# ---------------------------------------------------------------------------
# Wrapper
# ---------------------------------------------------------------------------

def init_net_params(key, fin, hid, out):
    """Matches nn.Linear default U(-1/sqrt(fan_in), +) and BN gamma=1 / beta=0.
    Linear weights are stored pre-transposed (in, out) so the kernel does x @ W directly."""
    k1, k2, k3, k4 = jax.random.split(key, 4)
    lim1 = 1.0 / float(fin) ** 0.5
    lim2 = 1.0 / float(hid) ** 0.5
    return dict(
        w1t=jax.random.uniform(k1, (fin, hid), jnp.float32, -lim1, lim1),
        b1=jax.random.uniform(k2, (1, hid), jnp.float32, -lim1, lim1),
        g1=jnp.ones((1, hid), jnp.float32),
        bt1=jnp.zeros((1, hid), jnp.float32),
        w2t=jax.random.uniform(k3, (hid, out), jnp.float32, -lim2, lim2),
        b2=jax.random.uniform(k4, (1, out), jnp.float32, -lim2, lim2),
        g2=jnp.ones((1, out), jnp.float32),
        bt2=jnp.zeros((1, out), jnp.float32),
    )


def initial_layer_forward(x, nets_p, irs_p, bs_p, number_nodes):
    """x: (batch, number_nodes, input_feature_size) -> (batch, number_nodes + 2, output_shape)."""
    batch = x.shape[0]
    nn_ = number_nodes
    fin = nets_p["w1t"].shape[0]
    hid = nets_p["w1t"].shape[1]
    out_dim = nets_p["w2t"].shape[1]

    # x_cat[b, ii*fin + j] = x[b, j, ii]  (the PyTorch per-node slice x[:, :, ii])
    x_cat = jnp.transpose(x, (0, 2, 1))[:, :nn_, :].reshape(batch, nn_ * fin)
    x_cat = x_cat.astype(jnp.float32)

    eye_n = jnp.eye(nn_, dtype=jnp.float32)
    nw1 = jnp.kron(eye_n, nets_p["w1t"])             # (Nn*fin, Nn*hid) block diagonal
    nw2 = jnp.kron(eye_n, nets_p["w2t"])             # (Nn*hid, Nn*out) block diagonal
    nb1 = jnp.tile(nets_p["b1"], (1, nn_))
    ng1 = jnp.tile(nets_p["g1"], (1, nn_))
    nbt1 = jnp.tile(nets_p["bt1"], (1, nn_))
    nb2 = jnp.tile(nets_p["b2"], (1, nn_))
    ng2 = jnp.tile(nets_p["g2"], (1, nn_))
    nbt2 = jnp.tile(nets_p["bt2"], (1, nn_))

    # node-mean operator: result = nodes @ mres
    mres = jnp.tile(jnp.eye(out_dim, dtype=jnp.float32), (nn_, 1)) / nn_   # (Nn*out, out)

    # combine_net_irs | combine_net_bs fused side by side
    tw1 = jnp.concatenate([irs_p["w1t"], bs_p["w1t"]], axis=1)             # (out, 2*hid)
    tb1 = jnp.concatenate([irs_p["b1"], bs_p["b1"]], axis=1)
    tg1 = jnp.concatenate([irs_p["g1"], bs_p["g1"]], axis=1)
    tbt1 = jnp.concatenate([irs_p["bt1"], bs_p["bt1"]], axis=1)
    tw2 = jnp.zeros((2 * hid, 2 * out_dim), jnp.float32)                   # (2*hid, 2*out)
    tw2 = tw2.at[:hid, :out_dim].set(irs_p["w2t"]).at[hid:, out_dim:].set(bs_p["w2t"])
    tb2 = jnp.concatenate([irs_p["b2"], bs_p["b2"]], axis=1)
    tg2 = jnp.concatenate([irs_p["g2"], bs_p["g2"]], axis=1)
    tbt2 = jnp.concatenate([irs_p["bt2"], bs_p["bt2"]], axis=1)

    vmem = pl.BlockSpec(memory_space=pltpu.MemorySpace.VMEM)
    flat = pl.pallas_call(
        _initial_layer_kernel,
        out_shape=jax.ShapeDtypeStruct((batch, (nn_ + 2) * out_dim), jnp.float32),
        in_specs=[vmem] * 18,
        out_specs=vmem,
    )(x_cat, mres,
      nw1, nb1, ng1, nbt1, nw2, nb2, ng2, nbt2,
      tw1, tb1, tg1, tbt1, tw2, tb2, tg2, tbt2)

    # (B, (Nn+2)*out) is already node-major along lanes -> a single wrapper reshape.
    return flat.reshape(batch, nn_ + 2, out_dim)


# ---------------------------------------------------------------------------
# Pure-JAX reference mirroring the PyTorch module (numerical self-check)
# ---------------------------------------------------------------------------

def _net_ref(xx, p):
    h = xx @ p["w1t"] + p["b1"]
    mu = h.mean(0, keepdims=True)
    var = ((h - mu) ** 2).mean(0, keepdims=True)
    h = jax.nn.sigmoid((h - mu) / jnp.sqrt(var + BN_EPS) * p["g1"] + p["bt1"])
    o = h @ p["w2t"] + p["b2"]
    mu = o.mean(0, keepdims=True)
    var = ((o - mu) ** 2).mean(0, keepdims=True)
    return jax.nn.sigmoid((o - mu) / jnp.sqrt(var + BN_EPS) * p["g2"] + p["bt2"])


def _initial_layer_ref(x, nets_p, irs_p, bs_p, number_nodes):
    nodes = jnp.stack([_net_ref(x[:, :, ii], nets_p) for ii in range(number_nodes)], axis=1)
    result = nodes.mean(axis=1)
    return jnp.concatenate(
        [nodes, _net_ref(result, irs_p)[:, None, :], _net_ref(result, bs_p)[:, None, :]],
        axis=1)


if __name__ == "__main__":
    key = jax.random.PRNGKey(0)

    batch = 4
    number_nodes = 8
    hidden = 32
    output_shape = 16
    input_shape = number_nodes          # Net in_features must match the (B, number_nodes) slice
    input_feature_size = number_nodes   # loop indexes the last dim up to number_nodes

    kx, k1, k2, k3 = jax.random.split(key, 4)
    x = jax.random.normal(kx, (batch, number_nodes, input_feature_size), jnp.float32)

    nets_p = init_net_params(k1, input_shape, hidden, output_shape)
    irs_p = init_net_params(k2, output_shape, hidden, output_shape)
    bs_p = init_net_params(k3, output_shape, hidden, output_shape)

    forward = jax.jit(initial_layer_forward, static_argnums=(4,))
    out = forward(x, nets_p, irs_p, bs_p, number_nodes)
    jax.block_until_ready(out)
    assert out.shape == (batch, number_nodes + 2, output_shape)

    ref = _initial_layer_ref(x, nets_p, irs_p, bs_p, number_nodes)
    err = float(jnp.max(jnp.abs(out - ref)))
    assert err < 1e-4, f"max |kernel - ref| = {err}"

    print("KERNEL_OK")
</pallas_src>

<mosaic_0001>
module attributes {stable_mosaic.version = 11 : i64} {
  func.func @_initial_layer_kernel(%arg0: memref<4x64xf32, #tpu.memory_space<vmem>>, %arg1: memref<128x16xf32, #tpu.memory_space<vmem>>, %arg2: memref<64x256xf32, #tpu.memory_space<vmem>>, %arg3: memref<1x256xf32, #tpu.memory_space<vmem>>, %arg4: memref<1x256xf32, #tpu.memory_space<vmem>>, %arg5: memref<1x256xf32, #tpu.memory_space<vmem>>, %arg6: memref<256x128xf32, #tpu.memory_space<vmem>>, %arg7: memref<1x128xf32, #tpu.memory_space<vmem>>, %arg8: memref<1x128xf32, #tpu.memory_space<vmem>>, %arg9: memref<1x128xf32, #tpu.memory_space<vmem>>, %arg10: memref<16x64xf32, #tpu.memory_space<vmem>>, %arg11: memref<1x64xf32, #tpu.memory_space<vmem>>, %arg12: memref<1x64xf32, #tpu.memory_space<vmem>>, %arg13: memref<1x64xf32, #tpu.memory_space<vmem>>, %arg14: memref<64x32xf32, #tpu.memory_space<vmem>>, %arg15: memref<1x32xf32, #tpu.memory_space<vmem>>, %arg16: memref<1x32xf32, #tpu.memory_space<vmem>>, %arg17: memref<1x32xf32, #tpu.memory_space<vmem>>, %arg18: memref<4x160xf32, #tpu.memory_space<vmem>>) attributes {dimension_semantics = [], scalar_prefetch = 0 : i64, scratch_operands = 0 : i64, tpu.core_type = #tpu.core_type<tc>} {
    %c0 = arith.constant 0 : index
    %c0_0 = arith.constant 0 : index
    %0 = vector.load %arg0[%c0, %c0_0] : memref<4x64xf32, #tpu.memory_space<vmem>>, vector<4x64xf32>
    %c0_1 = arith.constant 0 : index
    %c0_2 = arith.constant 0 : index
    %1 = vector.load %arg2[%c0_1, %c0_2] : memref<64x256xf32, #tpu.memory_space<vmem>>, vector<64x256xf32>
    %cst = arith.constant dense<0.000000e+00> : vector<4x256xf32>
    %2 = tpu.matmul %0, %1, %cst {dimension_numbers = #tpu.dot_dimension_numbers<[1], [0], [0], [1], [0, 0, 1, 1], [], []>} : vector<4x64xf32>, vector<64x256xf32>, vector<4x256xf32> -> vector<4x256xf32>
    %c0_3 = arith.constant 0 : index
    %c0_4 = arith.constant 0 : index
    %3 = vector.load %arg3[%c0_3, %c0_4] : memref<1x256xf32, #tpu.memory_space<vmem>>, vector<1x256xf32>
    %4 = vector.broadcast %3 : vector<1x256xf32> to vector<4x256xf32>
    %5 = arith.addf %2, %4 : vector<4x256xf32>
    %c0_5 = arith.constant 0 : index
    %c0_6 = arith.constant 0 : index
    %6 = vector.load %arg4[%c0_5, %c0_6] : memref<1x256xf32, #tpu.memory_space<vmem>>, vector<1x256xf32>
    %c0_7 = arith.constant 0 : index
    %c0_8 = arith.constant 0 : index
    %7 = vector.load %arg5[%c0_7, %c0_8] : memref<1x256xf32, #tpu.memory_space<vmem>>, vector<1x256xf32>
    %cst_9 = arith.constant dense<0.000000e+00> : vector<256xf32>
    %8 = vector.multi_reduction <add>, %5, %cst_9 [0] : vector<4x256xf32> to vector<256xf32>
    %9 = vector.shape_cast %8 : vector<256xf32> to vector<1x256xf32>
    %cst_10 = arith.constant 4.000000e+00 : f32
    %10 = vector.broadcast %cst_10 : f32 to vector<1x256xf32>
    %11 = arith.divf %9, %10 : vector<1x256xf32>
    %12 = vector.broadcast %11 : vector<1x256xf32> to vector<4x256xf32>
    %13 = arith.subf %5, %12 : vector<4x256xf32>
    %14 = arith.mulf %13, %13 : vector<4x256xf32>
    %cst_11 = arith.constant dense<0.000000e+00> : vector<256xf32>
    %15 = vector.multi_reduction <add>, %14, %cst_11 [0] : vector<4x256xf32> to vector<256xf32>
    %16 = vector.shape_cast %15 : vector<256xf32> to vector<1x256xf32>
    %cst_12 = arith.constant 4.000000e+00 : f32
    %17 = vector.broadcast %cst_12 : f32 to vector<1x256xf32>
    %18 = arith.divf %16, %17 : vector<1x256xf32>
    %cst_13 = arith.constant 9.99999974E-6 : f32
    %19 = vector.broadcast %cst_13 : f32 to vector<1x256xf32>
    %20 = arith.addf %18, %19 : vector<1x256xf32>
    %21 = math.rsqrt %20 : vector<1x256xf32>
    %22 = vector.broadcast %21 : vector<1x256xf32> to vector<4x256xf32>
    %23 = arith.mulf %13, %22 : vector<4x256xf32>
    %24 = vector.broadcast %6 : vector<1x256xf32> to vector<4x256xf32>
    %25 = arith.mulf %23, %24 : vector<4x256xf32>
    %26 = vector.broadcast %7 : vector<1x256xf32> to vector<4x256xf32>
    %27 = arith.addf %25, %26 : vector<4x256xf32>
    %28 = arith.negf %27 : vector<4x256xf32>
    %29 = math.exp %28 : vector<4x256xf32>
    %cst_14 = arith.constant 1.000000e+00 : f32
    %30 = vector.broadcast %cst_14 : f32 to vector<4x256xf32>
    %31 = arith.addf %30, %29 : vector<4x256xf32>
    %32 = arith.divf %30, %31 : vector<4x256xf32>
    %c0_15 = arith.constant 0 : index
    %c0_16 = arith.constant 0 : index
    %33 = vector.load %arg6[%c0_15, %c0_16] : memref<256x128xf32, #tpu.memory_space<vmem>>, vector<256x128xf32>
    %cst_17 = arith.constant dense<0.000000e+00> : vector<4x128xf32>
    %34 = tpu.matmul %32, %33, %cst_17 {dimension_numbers = #tpu.dot_dimension_numbers<[1], [0], [0], [1], [0, 0, 1, 1], [], []>} : vector<4x256xf32>, vector<256x128xf32>, vector<4x128xf32> -> vector<4x128xf32>
    %c0_18 = arith.constant 0 : index
    %c0_19 = arith.constant 0 : index
    %35 = vector.load %arg7[%c0_18, %c0_19] : memref<1x128xf32, #tpu.memory_space<vmem>>, vector<1x128xf32>
    %36 = vector.broadcast %35 : vector<1x128xf32> to vector<4x128xf32>
    %37 = arith.addf %34, %36 : vector<4x128xf32>
    %c0_20 = arith.constant 0 : index
    %c0_21 = arith.constant 0 : index
    %38 = vector.load %arg8[%c0_20, %c0_21] : memref<1x128xf32, #tpu.memory_space<vmem>>, vector<1x128xf32>
    %c0_22 = arith.constant 0 : index
    %c0_23 = arith.constant 0 : index
    %39 = vector.load %arg9[%c0_22, %c0_23] : memref<1x128xf32, #tpu.memory_space<vmem>>, vector<1x128xf32>
    %cst_24 = arith.constant dense<0.000000e+00> : vector<128xf32>
    %40 = vector.multi_reduction <add>, %37, %cst_24 [0] : vector<4x128xf32> to vector<128xf32>
    %41 = vector.shape_cast %40 : vector<128xf32> to vector<1x128xf32>
    %cst_25 = arith.constant 4.000000e+00 : f32
    %42 = vector.broadcast %cst_25 : f32 to vector<1x128xf32>
    %43 = arith.divf %41, %42 : vector<1x128xf32>
    %44 = vector.broadcast %43 : vector<1x128xf32> to vector<4x128xf32>
    %45 = arith.subf %37, %44 : vector<4x128xf32>
    %46 = arith.mulf %45, %45 : vector<4x128xf32>
    %cst_26 = arith.constant dense<0.000000e+00> : vector<128xf32>
    %47 = vector.multi_reduction <add>, %46, %cst_26 [0] : vector<4x128xf32> to vector<128xf32>
    %48 = vector.shape_cast %47 : vector<128xf32> to vector<1x128xf32>
    %cst_27 = arith.constant 4.000000e+00 : f32
    %49 = vector.broadcast %cst_27 : f32 to vector<1x128xf32>
    %50 = arith.divf %48, %49 : vector<1x128xf32>
    %cst_28 = arith.constant 9.99999974E-6 : f32
    %51 = vector.broadcast %cst_28 : f32 to vector<1x128xf32>
    %52 = arith.addf %50, %51 : vector<1x128xf32>
    %53 = math.rsqrt %52 : vector<1x128xf32>
    %54 = vector.broadcast %53 : vector<1x128xf32> to vector<4x128xf32>
    %55 = arith.mulf %45, %54 : vector<4x128xf32>
    %56 = vector.broadcast %38 : vector<1x128xf32> to vector<4x128xf32>
    %57 = arith.mulf %55, %56 : vector<4x128xf32>
    %58 = vector.broadcast %39 : vector<1x128xf32> to vector<4x128xf32>
    %59 = arith.addf %57, %58 : vector<4x128xf32>
    %60 = arith.negf %59 : vector<4x128xf32>
    %61 = math.exp %60 : vector<4x128xf32>
    %cst_29 = arith.constant 1.000000e+00 : f32
    %62 = vector.broadcast %cst_29 : f32 to vector<4x128xf32>
    %63 = arith.addf %62, %61 : vector<4x128xf32>
    %64 = arith.divf %62, %63 : vector<4x128xf32>
    %c0_30 = arith.constant 0 : index
    %c0_31 = arith.constant 0 : index
    %65 = vector.load %arg1[%c0_30, %c0_31] : memref<128x16xf32, #tpu.memory_space<vmem>>, vector<128x16xf32>
    %cst_32 = arith.constant dense<0.000000e+00> : vector<4x16xf32>
    %66 = tpu.matmul %64, %65, %cst_32 {dimension_numbers = #tpu.dot_dimension_numbers<[1], [0], [0], [1], [0, 0, 1, 1], [], []>} : vector<4x128xf32>, vector<128x16xf32>, vector<4x16xf32> -> vector<4x16xf32>
    %c0_33 = arith.constant 0 : index
    %c0_34 = arith.constant 0 : index
    %67 = vector.load %arg10[%c0_33, %c0_34] : memref<16x64xf32, #tpu.memory_space<vmem>>, vector<16x64xf32>
    %cst_35 = arith.constant dense<0.000000e+00> : vector<4x64xf32>
    %68 = tpu.matmul %66, %67, %cst_35 {dimension_numbers = #tpu.dot_dimension_numbers<[1], [0], [0], [1], [0, 0, 1, 1], [], []>} : vector<4x16xf32>, vector<16x64xf32>, vector<4x64xf32> -> vector<4x64xf32>
    %c0_36 = arith.constant 0 : index
    %c0_37 = arith.constant 0 : index
    %69 = vector.load %arg11[%c0_36, %c0_37] : memref<1x64xf32, #tpu.memory_space<vmem>>, vector<1x64xf32>
    %70 = vector.broadcast %69 : vector<1x64xf32> to vector<4x64xf32>
    %71 = arith.addf %68, %70 : vector<4x64xf32>
    %c0_38 = arith.constant 0 : index
    %c0_39 = arith.constant 0 : index
    %72 = vector.load %arg12[%c0_38, %c0_39] : memref<1x64xf32, #tpu.memory_space<vmem>>, vector<1x64xf32>
    %c0_40 = arith.constant 0 : index
    %c0_41 = arith.constant 0 : index
    %73 = vector.load %arg13[%c0_40, %c0_41] : memref<1x64xf32, #tpu.memory_space<vmem>>, vector<1x64xf32>
    %cst_42 = arith.constant dense<0.000000e+00> : vector<64xf32>
    %74 = vector.multi_reduction <add>, %71, %cst_42 [0] : vector<4x64xf32> to vector<64xf32>
    %75 = vector.shape_cast %74 : vector<64xf32> to vector<1x64xf32>
    %cst_43 = arith.constant 4.000000e+00 : f32
    %76 = vector.broadcast %cst_43 : f32 to vector<1x64xf32>
    %77 = arith.divf %75, %76 : vector<1x64xf32>
    %78 = vector.broadcast %77 : vector<1x64xf32> to vector<4x64xf32>
    %79 = arith.subf %71, %78 : vector<4x64xf32>
    %80 = arith.mulf %79, %79 : vector<4x64xf32>
    %cst_44 = arith.constant dense<0.000000e+00> : vector<64xf32>
    %81 = vector.multi_reduction <add>, %80, %cst_44 [0] : vector<4x64xf32> to vector<64xf32>
    %82 = vector.shape_cast %81 : vector<64xf32> to vector<1x64xf32>
    %cst_45 = arith.constant 4.000000e+00 : f32
    %83 = vector.broadcast %cst_45 : f32 to vector<1x64xf32>
    %84 = arith.divf %82, %83 : vector<1x64xf32>
    %cst_46 = arith.constant 9.99999974E-6 : f32
    %85 = vector.broadcast %cst_46 : f32 to vector<1x64xf32>
    %86 = arith.addf %84, %85 : vector<1x64xf32>
    %87 = math.rsqrt %86 : vector<1x64xf32>
    %88 = vector.broadcast %87 : vector<1x64xf32> to vector<4x64xf32>
    %89 = arith.mulf %79, %88 : vector<4x64xf32>
    %90 = vector.broadcast %72 : vector<1x64xf32> to vector<4x64xf32>
    %91 = arith.mulf %89, %90 : vector<4x64xf32>
    %92 = vector.broadcast %73 : vector<1x64xf32> to vector<4x64xf32>
    %93 = arith.addf %91, %92 : vector<4x64xf32>
    %94 = arith.negf %93 : vector<4x64xf32>
    %95 = math.exp %94 : vector<4x64xf32>
    %cst_47 = arith.constant 1.000000e+00 : f32
    %96 = vector.broadcast %cst_47 : f32 to vector<4x64xf32>
    %97 = arith.addf %96, %95 : vector<4x64xf32>
    %98 = arith.divf %96, %97 : vector<4x64xf32>
    %c0_48 = arith.constant 0 : index
    %c0_49 = arith.constant 0 : index
    %99 = vector.load %arg14[%c0_48, %c0_49] : memref<64x32xf32, #tpu.memory_space<vmem>>, vector<64x32xf32>
    %cst_50 = arith.constant dense<0.000000e+00> : vector<4x32xf32>
    %100 = tpu.matmul %98, %99, %cst_50 {dimension_numbers = #tpu.dot_dimension_numbers<[1], [0], [0], [1], [0, 0, 1, 1], [], []>} : vector<4x64xf32>, vector<64x32xf32>, vector<4x32xf32> -> vector<4x32xf32>
    %c0_51 = arith.constant 0 : index
    %c0_52 = arith.constant 0 : index
    %101 = vector.load %arg15[%c0_51, %c0_52] : memref<1x32xf32, #tpu.memory_space<vmem>>, vector<1x32xf32>
    %102 = vector.broadcast %101 : vector<1x32xf32> to vector<4x32xf32>
    %103 = arith.addf %100, %102 : vector<4x32xf32>
    %c0_53 = arith.constant 0 : index
    %c0_54 = arith.constant 0 : index
    %104 = vector.load %arg16[%c0_53, %c0_54] : memref<1x32xf32, #tpu.memory_space<vmem>>, vector<1x32xf32>
    %c0_55 = arith.constant 0 : index
    %c0_56 = arith.constant 0 : index
    %105 = vector.load %arg17[%c0_55, %c0_56] : memref<1x32xf32, #tpu.memory_space<vmem>>, vector<1x32xf32>
    %cst_57 = arith.constant dense<0.000000e+00> : vector<32xf32>
    %106 = vector.multi_reduction <add>, %103, %cst_57 [0] : vector<4x32xf32> to vector<32xf32>
    %107 = vector.shape_cast %106 : vector<32xf32> to vector<1x32xf32>
    %cst_58 = arith.constant 4.000000e+00 : f32
    %108 = vector.broadcast %cst_58 : f32 to vector<1x32xf32>
    %109 = arith.divf %107, %108 : vector<1x32xf32>
    %110 = vector.broadcast %109 : vector<1x32xf32> to vector<4x32xf32>
    %111 = arith.subf %103, %110 : vector<4x32xf32>
    %112 = arith.mulf %111, %111 : vector<4x32xf32>
    %cst_59 = arith.constant dense<0.000000e+00> : vector<32xf32>
    %113 = vector.multi_reduction <add>, %112, %cst_59 [0] : vector<4x32xf32> to vector<32xf32>
    %114 = vector.shape_cast %113 : vector<32xf32> to vector<1x32xf32>
    %cst_60 = arith.constant 4.000000e+00 : f32
    %115 = vector.broadcast %cst_60 : f32 to vector<1x32xf32>
    %116 = arith.divf %114, %115 : vector<1x32xf32>
    %cst_61 = arith.constant 9.99999974E-6 : f32
    %117 = vector.broadcast %cst_61 : f32 to vector<1x32xf32>
    %118 = arith.addf %116, %117 : vector<1x32xf32>
    %119 = math.rsqrt %118 : vector<1x32xf32>
    %120 = vector.broadcast %119 : vector<1x32xf32> to vector<4x32xf32>
    %121 = arith.mulf %111, %120 : vector<4x32xf32>
    %122 = vector.broadcast %104 : vector<1x32xf32> to vector<4x32xf32>
    %123 = arith.mulf %121, %122 : vector<4x32xf32>
    %124 = vector.broadcast %105 : vector<1x32xf32> to vector<4x32xf32>
    %125 = arith.addf %123, %124 : vector<4x32xf32>
    %126 = arith.negf %125 : vector<4x32xf32>
    %127 = math.exp %126 : vector<4x32xf32>
    %cst_62 = arith.constant 1.000000e+00 : f32
    %128 = vector.broadcast %cst_62 : f32 to vector<4x32xf32>
    %129 = arith.addf %128, %127 : vector<4x32xf32>
    %130 = arith.divf %128, %129 : vector<4x32xf32>
    %c0_63 = arith.constant 0 : index
    %c0_64 = arith.constant 0 : index
    %131 = vector.load %arg18[%c0_63, %c0_64] : memref<4x160xf32, #tpu.memory_space<vmem>>, vector<4x128xf32>
    tpu.vector_store %arg18[%c0_63, %c0_64], %64 {strides = array<i32>} : memref<4x160xf32, #tpu.memory_space<vmem>>, vector<4x128xf32>,
    %c0_65 = arith.constant 0 : index
    %c128 = arith.constant 128 : index
    %132 = vector.load %arg18[%c0_65, %c128] : memref<4x160xf32, #tpu.memory_space<vmem>>, vector<4x32xf32>
    tpu.vector_store %arg18[%c0_65, %c128], %130 {strides = array<i32>} : memref<4x160xf32, #tpu.memory_space<vmem>>, vector<4x32xf32>,
    return
  }
}

</mosaic_0001>

<bundles_post_ra>
// kernel: initial_layer_forward.1
= control target key start
LH: loop header
LB: loop body
LE: loop exit
PB: predicated region body
PF: predicated region fallthrough
CT: control target
= control target key end

     0   :  { %v924_v3 = vmov 0.0   ;;  %vm88_vm0 = vcmask 523264   ;;  %v78_v50 = vlaneseq  ;;  %vm165_vm1 = vcmask 1043456   ;;  %s1342_s2 = inlined_call_operand.vmem [shape: f32[64,256], index: 2, kind: input, shape index: {}]   ;;  %s1343_s0 = inlined_call_operand.vmem [shape: f32[4,64], index: 0, kind: input, shape index: {}]   ;;  %s1344_s6 = inlined_call_operand.vmem [shape: f32[256,128], index: 6, kind: input, shape index: {}]   ;;  %s1345_s3 = inlined_call_operand.vmem [shape: f32[1,256], index: 3, kind: input, shape index: {}]   ;;  %s1346_s4 = inlined_call_operand.vmem [shape: f32[1,256], index: 4, kind: input, shape index: {}]   ;;  %s1347_s5 = inlined_call_operand.vmem [shape: f32[1,256], index: 5, kind: input, shape index: {}]   ;;  %s1348_s1 = inlined_call_operand.vmem [shape: f32[128,16], index: 1, kind: input, shape index: {}]   ;;  %s1349_s10 = inlined_call_operand.vmem [shape: f32[16,64], index: 10, kind: input, shape index: {}]   ;;  %s1350_s7 = inlined_call_operand.vmem [shape: f32[1,128], index: 7, kind: input, shape index: {}]   ;;  %s1351_s8 = inlined_call_operand.vmem [shape: f32[1,128], index: 8, kind: input, shape index: {}]   ;;  %s1352_s9 = inlined_call_operand.vmem [shape: f32[1,128], index: 9, kind: input, shape index: {}]   ;;  %s1353_s18 = inlined_call_operand.vmem [shape: f32[4,160], index: 18, kind: output, shape index: {}]   ;;  %s1354_s14 = inlined_call_operand.vmem [shape: f32[64,32], index: 14, kind: input, shape index: {}]   ;;  %s1355_s11 = inlined_call_operand.vmem [shape: f32[1,64], index: 11, kind: input, shape index: {}]   ;;  %s1356_s12 = inlined_call_operand.vmem [shape: f32[1,64], index: 12, kind: input, shape index: {}]   ;;  %s1357_s13 = inlined_call_operand.vmem [shape: f32[1,64], index: 13, kind: input, shape index: {}]   ;;  %s1358_s15 = inlined_call_operand.vmem [shape: f32[1,32], index: 15, kind: input, shape index: {}]   ;;  %s1359_s16 = inlined_call_operand.vmem [shape: f32[1,32], index: 16, kind: input, shape index: {}]   ;;  %s1360_s17 = inlined_call_operand.vmem [shape: f32[1,32], index: 17, kind: input, shape index: {}]  }
   0x1   :  { %1363 = sst [smem:[#allocation2_spill]] %s1342_s2  ;;  %156 = vmatprep.mubr.f32.mxu0 %v924_v3  ;;  %v76_v53 = vld [vmem:[%s1345_s3] sm:$0x3]  ;;  %vm925_vm2 = vmmov 0   ;;  %vm494_vm3 = vcmask 130048   ;;  %vm570_vm4 = vcmask 519168  }
   0x2   :  { %1364 = sst [smem:[#allocation3_spill]] %s1343_s0  ;;  %v79_v51 = vshrl.u32 %v78_v50, 7  ;;  %vm702_vm5 = vcmask 257024  }
   0x3   :  { %1365 = sst [smem:[#allocation4_spill]] %s1344_s6 }
   0x4   :  { %s1366_s29 = sld [smem:[#allocation2_spill]]  ;;  %v1172_v52 = vsub.s32 0, %v79_v51  ;;  %v1177_v54 = vsub.s32 1, %v79_v51 }
   0x5   :  { %s1367_s20 = sld [smem:[#allocation3_spill]] }
   0x6   :  { %s1368_s6 = sld [smem:[#allocation4_spill]]  ;;  %v81_v55 = vrot.slane %v76_v53, %v1172_v52  ;;  %v85_v56 = vrot.slane %v76_v53, %v1177_v54 }
   0xa   :  { %v75_v0 = vld [vmem:[%s1366_s29 + $0x78] sm:$0xff]  ;;  %v74_v1 = vld [vmem:[%s1366_s29 + $0x70] sm:$0xff]  ;;  %v73_v2 = vld [vmem:[%s1366_s29 + $0x68] sm:$0xff] }
   0xb   :  { %108 = vmatprep.subr.mxu0 %v75_v0  ;;  %v72_v4 = vld [vmem:[%s1366_s29 + $0x60] sm:$0xff]  ;;  %v71_v5 = vld [vmem:[%s1366_s29 + $0x58] sm:$0xff]  ;;  %v70_v6 = vld [vmem:[%s1366_s29 + $0x50] sm:$0xff] }
   0xc   :  { %109 = vmatpush1.msra.mxu0 %v74_v1  ;;  %v69_v7 = vld [vmem:[%s1366_s29 + $0x48] sm:$0xff]  ;;  %v68_v8 = vld [vmem:[%s1366_s29 + $0x40] sm:$0xff]  ;;  %v67_v9 = vld [vmem:[%s1366_s29 + $0x38] sm:$0xff] }
   0xd   :  { %110 = vmatprep.subr.mxu0 %v73_v2  ;;  %v66_v10 = vld [vmem:[%s1366_s29 + $0x30] sm:$0xff]  ;;  %v65_v11 = vld [vmem:[%s1366_s29 + $0x28] sm:$0xff]  ;;  %v64_v12 = vld [vmem:[%s1366_s29 + $0x20] sm:$0xff] }
   0xe   :  { %111 = vmatpush1.msra.mxu0 %v72_v4  ;;  %v63_v13 = vld [vmem:[%s1366_s29 + $0x18] sm:$0xff]  ;;  %v62_v14 = vld [vmem:[%s1366_s29 + $0x10] sm:$0xff]  ;;  %v61_v15 = vld [vmem:[%s1366_s29 + $0x8] sm:$0xff] }
   0xf   :  { %112 = vmatprep.subr.mxu0 %v71_v5  ;;  %v60_v16 = vld [vmem:[%s1366_s29] sm:$0xff]  ;;  %v278_v18 = vld [vmem:[%s1368_s6 + $0xf8] sm:$0xff]  ;;  %v277_v20 = vld [vmem:[%s1368_s6 + $0xf0] sm:$0xff] }
  0x10   :  { %113 = vmatpush1.msra.mxu0 %v70_v6  ;;  %v59_v17 = vld [vmem:[%s1367_s20] sm:$0xf]  ;;  %767 = vmatprep.subr.mxu1 %v278_v18  ;;  %v262_v19 = vld [vmem:[%s1368_s6 + $0x78] sm:$0xff]  ;;  %v261_v21 = vld [vmem:[%s1368_s6 + $0x70] sm:$0xff] }
  0x11   :  { %114 = vmatprep.subr.mxu0 %v69_v7  ;;  %768 = vmatpush3.msra.mxu1 %v262_v19  ;;  %v276_v22 = vld [vmem:[%s1368_s6 + $0xe8] sm:$0xff]  ;;  %v275_v24 = vld [vmem:[%s1368_s6 + $0xe0] sm:$0xff]  ;;  %v274_v26 = vld [vmem:[%s1368_s6 + $0xd8] sm:$0xff] }
  0x12   :  { %115 = vmatpush1.msra.mxu0 %v68_v8  ;;  %769 = vmatprep.subr.mxu1 %v277_v20  ;;  %v260_v23 = vld [vmem:[%s1368_s6 + $0x68] sm:$0xff]  ;;  %v259_v25 = vld [vmem:[%s1368_s6 + $0x60] sm:$0xff]  ;;  %v258_v27 = vld [vmem:[%s1368_s6 + $0x58] sm:$0xff] }
  0x13   :  { %116 = vmatprep.subr.mxu0 %v67_v9  ;;  %770 = vmatpush3.msra.mxu1 %v261_v21  ;;  %v273_v28 = vld [vmem:[%s1368_s6 + $0xd0] sm:$0xff]  ;;  %v272_v30 = vld [vmem:[%s1368_s6 + $0xc8] sm:$0xff]  ;;  %v271_v32 = vld [vmem:[%s1368_s6 + $0xc0] sm:$0xff] }
  0x14   :  { %117 = vmatpush1.msra.mxu0 %v66_v10  ;;  %771 = vmatprep.subr.mxu1 %v276_v22  ;;  %v257_v29 = vld [vmem:[%s1368_s6 + $0x50] sm:$0xff]  ;;  %v256_v31 = vld [vmem:[%s1368_s6 + $0x48] sm:$0xff]  ;;  %v255_v33 = vld [vmem:[%s1368_s6 + $0x40] sm:$0xff] }
  0x15   :  { %118 = vmatprep.subr.mxu0 %v65_v11  ;;  %772 = vmatpush3.msra.mxu1 %v260_v23  ;;  %v270_v34 = vld [vmem:[%s1368_s6 + $0xb8] sm:$0xff]  ;;  %v269_v36 = vld [vmem:[%s1368_s6 + $0xb0] sm:$0xff]  ;;  %v268_v38 = vld [vmem:[%s1368_s6 + $0xa8] sm:$0xff] }
  0x16   :  { %119 = vmatpush1.msra.mxu0 %v64_v12  ;;  %773 = vmatprep.subr.mxu1 %v275_v24  ;;  %v254_v35 = vld [vmem:[%s1368_s6 + $0x38] sm:$0xff]  ;;  %v253_v37 = vld [vmem:[%s1368_s6 + $0x30] sm:$0xff]  ;;  %v252_v39 = vld [vmem:[%s1368_s6 + $0x28] sm:$0xff] }
  0x17   :  { %120 = vmatprep.subr.mxu0 %v63_v13  ;;  %774 = vmatpush3.msra.mxu1 %v259_v25  ;;  %v267_v40 = vld [vmem:[%s1368_s6 + $0xa0] sm:$0xff]  ;;  %v266_v42 = vld [vmem:[%s1368_s6 + $0x98] sm:$0xff]  ;;  %v265_v44 = vld [vmem:[%s1368_s6 + $0x90] sm:$0xff] }
  0x18   :  { %121 = vmatpush1.msra.mxu0 %v62_v14  ;;  %775 = vmatprep.subr.mxu1 %v274_v26  ;;  %v251_v41 = vld [vmem:[%s1368_s6 + $0x20] sm:$0xff]  ;;  %v250_v43 = vld [vmem:[%s1368_s6 + $0x18] sm:$0xff]  ;;  %v249_v45 = vld [vmem:[%s1368_s6 + $0x10] sm:$0xff] }
  0x19   :  { %122 = vmatprep.subr.mxu0 %v61_v15  ;;  %776 = vmatpush3.msra.mxu1 %v258_v27  ;;  %v264_v46 = vld [vmem:[%s1368_s6 + $0x88] sm:$0xff]  ;;  %v263_v48 = vld [vmem:[%s1368_s6 + $0x80] sm:$0xff] }
  0x1a   :  { %123 = vmatpush1.msra.mxu0 %v60_v16  ;;  %777 = vmatprep.subr.mxu1 %v273_v28  ;;  %v248_v47 = vld [vmem:[%s1368_s6 + $0x8] sm:$0xff]  ;;  %v247_v49 = vld [vmem:[%s1368_s6] sm:$0xff] }
  0x1b   :  { %750 = vmatmul.mubr.msk.f32.vlgmr.msra.gmra.mxu0 %vm88_vm0, %v59_v17  ;;  %831 = vmatprep.subr.mxu0 %v924_v3 }
  0x1c   :  { %778 = vmatpush3.msra.mxu1 %v257_v29  ;;  %863 = vmatprep.mubr.msk.f32.mxu0 %vm925_vm2, %v924_v3 }
  0x1d   :  { %779 = vmatprep.subr.mxu1 %v272_v30 }
  0x1e   :  { %780 = vmatpush3.msra.mxu1 %v256_v31 }
  0x1f   :  { %781 = vmatprep.subr.mxu1 %v271_v32 }
  0x20   :  { %782 = vmatpush3.msra.mxu1 %v255_v33 }
  0x21   :  { %783 = vmatprep.subr.mxu1 %v270_v34 }
  0x22   :  { %784 = vmatpush3.msra.mxu1 %v254_v35 }
  0x23   :  { %785 = vmatprep.subr.mxu1 %v269_v36  ;;  %v163_v36 = vld [vmem:[%s1346_s4] sm:$0x3] }
  0x24   :  { %786 = vmatpush3.msra.mxu1 %v253_v37  ;;  %v164_v37 = vld [vmem:[%s1347_s5] sm:$0x3] }
  0x25   :  { %787 = vmatprep.subr.mxu1 %v268_v38  ;;  %v213_v38 = vrot.slane %v163_v36, %v1172_v52 }
  0x26   :  { %788 = vmatpush3.msra.mxu1 %v252_v39 }
  0x27   :  { %789 = vmatprep.subr.mxu1 %v267_v40 }
  0x28   :  { %790 = vmatpush3.msra.mxu1 %v251_v41  ;;  %v226_v41 = vrot.slane %v164_v37, %v1172_v52 }
  0x29   :  { %791 = vmatprep.subr.mxu1 %v266_v42  ;;  %v217_v42 = vrot.slane %v163_v36, %v1177_v54 }
  0x2a   :  { %792 = vmatpush3.msra.mxu1 %v250_v43 }
  0x2b   :  { %793 = vmatprep.subr.mxu1 %v265_v44 }
  0x2c   :  { %794 = vmatpush3.msra.mxu1 %v249_v45 }
  0x2d   :  { %795 = vmatprep.subr.mxu1 %v264_v46  ;;  %v230_v46 = vrot.slane %v164_v37, %v1177_v54  ;;  %v414_v54 = vld [vmem:[%s1348_s1 + $0x78] sm:$0xff] }
  0x2e   :  { %796 = vmatpush3.msra.mxu1 %v248_v47  ;;  %832 = vmatpush3.msra.mxu0 %v414_v54 }
  0x2f   :  { %797 = vmatprep.subr.mxu1 %v263_v48  ;;  %833 = vmatprep.subr.mxu0 %v924_v3 }
  0x30   :  { %798 = vmatpush3.msra.mxu1 %v247_v49 }
  0x31   :  { %866 = vmatprep.subr.mxu1 %v924_v3 }
  0xdb   :  { %v158_v57 = vpop.f32.mrf.mxu0 }
  0xdc   :  { %v159_v58 = vadd.f32 %v158_v57, %v81_v55 }
  0xdd   :  { %v160_v59 = vpop.f32.mrf.mxu0 }
  0xde   :  { %v166_v60 = vsel %vm165_vm1, %v159_v58, 0.0  ;;  %v161_v61 = vadd.f32 %v160_v59, %v85_v56  ;;  %v413_v59 = vld [vmem:[%s1348_s1 + $0x70] sm:$0xff] }
  0xdf   :  { %v167_v62 = vrot.slane %v166_v60, 4  ;;  %834 = vmatpush3.msra.mxu0 %v413_v59 }
  0xe0   :  { %v173_v63 = vsel %vm165_vm1, %v161_v61, 0.0  ;;  %835 = vmatprep.subr.mxu0 %v924_v3 }
  0xe1   :  { %v168_v0 = vadd.f32 %v167_v62, %v166_v60  ;;  %v174_v1 = vrot.slane %v173_v63, 4  ;;  %v412_v60 = vld [vmem:[%s1348_s1 + $0x68] sm:$0xff]  ;;  %v410_v62 = vld [vmem:[%s1348_s1 + $0x58] sm:$0xff] }
  0xe2   :  { %836 = vmatpush3.msra.mxu0 %v412_v60 }
  0xe3   :  { %v169_v2 = vrot.slane %v168_v0, 2  ;;  %v175_v4 = vadd.f32 %v174_v1, %v173_v63  ;;  %837 = vmatprep.subr.mxu0 %v924_v3  ;;  %v409_v63 = vld [vmem:[%s1348_s1 + $0x50] sm:$0xff]  ;;  %v407_v1 = vld [vmem:[%s1348_s1 + $0x40] sm:$0xff] }
  0xe5   :  { %v170_v5 = vadd.f32 %v169_v2, %v168_v0  ;;  %v176_v6 = vrot.slane %v175_v4, 2  ;;  %v408_v0 = vld [vmem:[%s1348_s1 + $0x48] sm:$0xff]  ;;  %v406_v2 = vld [vmem:[%s1348_s1 + $0x38] sm:$0xff] }
  0xe7   :  { %v171_v7 = vrot.slane %v170_v5, 1  ;;  %v177_v8 = vadd.f32 %v176_v6, %v175_v4  ;;  %v405_v4 = vld [vmem:[%s1348_s1 + $0x30] sm:$0xff]  ;;  %v403_v6 = vld [vmem:[%s1348_s1 + $0x20] sm:$0xff] }
  0xe9   :  { %v172_v9 = vadd.f32 %v171_v7, %v170_v5  ;;  %v178_v10 = vrot.slane %v177_v8, 1  ;;  %v404_v5 = vld [vmem:[%s1348_s1 + $0x28] sm:$0xff]  ;;  %v402_v7 = vld [vmem:[%s1348_s1 + $0x18] sm:$0xff] }
  0xeb   :  { %v181_v11 = vmul.f32 0.25, %v172_v9  ;;  %v179_v12 = vadd.f32 %v178_v10, %v177_v8  ;;  %v401_v8 = vld [vmem:[%s1348_s1 + $0x10] sm:$0xff]  ;;  %v400_v9 = vld [vmem:[%s1348_s1 + $0x8] sm:$0xff]  ;;  %v399_v10 = vld [vmem:[%s1348_s1] sm:$0xff] }
  0xed   :  { %v183_v13 = vsub.f32 %v159_v58, %v181_v11  ;;  %v182_v14 = vmul.f32 0.25, %v179_v12  ;;  %v486_v11 = vld [vmem:[%s1349_s10 + $0x8] sm:$0xff]  ;;  %v485_v12 = vld [vmem:[%s1349_s10] sm:$0xff] }
  0xef   :  { %v185_v15 = vmul.f32 %v183_v13, %v183_v13  ;;  %v184_v16 = vsub.f32 %v161_v61, %v182_v14  ;;  %v411_v61 = vld [vmem:[%s1348_s1 + $0x60] sm:$0xff] }
  0xf0   :  { %838 = vmatpush3.msra.mxu0 %v411_v61  ;;  %v753_v14 = vld [vmem:[%s1350_s7] ss:$0 sm:$0xff] }
  0xf1   :  { %v187_v17 = vsel %vm165_vm1, %v185_v15, 0.0  ;;  %v186_v18 = vmul.f32 %v184_v16, %v184_v16  ;;  %839 = vmatprep.subr.mxu0 %v924_v3 }
  0xf2   :  { %v188_v19 = vrot.slane %v187_v17, 4  ;;  %840 = vmatpush3.msra.mxu0 %v410_v62 }
  0xf3   :  { %v194_v20 = vsel %vm165_vm1, %v186_v18, 0.0  ;;  %841 = vmatprep.subr.mxu0 %v924_v3 }
  0xf4   :  { %v189_v21 = vadd.f32 %v188_v19, %v187_v17  ;;  %v195_v22 = vrot.slane %v194_v20, 4  ;;  %842 = vmatpush3.msra.mxu0 %v409_v63 }
  0xf5   :  { %843 = vmatprep.subr.mxu0 %v924_v3 }
  0xf6   :  { %v190_v23 = vrot.slane %v189_v21, 2  ;;  %v196_v24 = vadd.f32 %v195_v22, %v194_v20  ;;  %844 = vmatpush3.msra.mxu0 %v408_v0 }
  0xf7   :  { %845 = vmatprep.subr.mxu0 %v924_v3 }
  0xf8   :  { %v191_v25 = vadd.f32 %v190_v23, %v189_v21  ;;  %v197_v26 = vrot.slane %v196_v24, 2  ;;  %846 = vmatpush3.msra.mxu0 %v407_v1 }
  0xf9   :  { %847 = vmatprep.subr.mxu0 %v924_v3 }
  0xfa   :  { %v192_v27 = vrot.slane %v191_v25, 1  ;;  %v198_v28 = vadd.f32 %v197_v26, %v196_v24  ;;  %848 = vmatpush3.msra.mxu0 %v406_v2 }
  0xfb   :  { %849 = vmatprep.subr.mxu0 %v924_v3 }
  0xfc   :  { %v193_v29 = vadd.f32 %v192_v27, %v191_v25  ;;  %v199_v30 = vrot.slane %v198_v28, 1  ;;  %850 = vmatpush3.msra.mxu0 %v405_v4 }
  0xfd   :  { %851 = vmatprep.subr.mxu0 %v924_v3 }
  0xfe   :  { %v201_v31 = vmul.f32 0.25, %v193_v29  ;;  %v200_v32 = vadd.f32 %v199_v30, %v198_v28  ;;  %852 = vmatpush3.msra.mxu0 %v404_v5 }
  0xff   :  { %853 = vmatprep.subr.mxu0 %v924_v3 }
 0x100   :  { %v203_v33 = vadd.f32 1e-05, %v201_v31  ;;  %v202_v34 = vmul.f32 0.25, %v200_v32  ;;  %854 = vmatpush3.msra.mxu0 %v403_v6 }
 0x101   :  { %855 = vmatprep.subr.mxu0 %v924_v3 }
 0x102   :  { %894 = vrsqrt.f32 %v203_v33  ;;  %v204_v35 = vadd.f32 1e-05, %v202_v34  ;;  %856 = vmatpush3.msra.mxu0 %v402_v7 }
 0x103   :  { %857 = vmatprep.subr.mxu0 %v924_v3 }
 0x104   :  { %896 = vrsqrt.f32 %v204_v35  ;;  %858 = vmatpush3.msra.mxu0 %v401_v8 }
 0x105   :  { %859 = vmatprep.subr.mxu0 %v924_v3 }
 0x106   :  { %860 = vmatpush3.msra.mxu0 %v400_v9 }
 0x107   :  { %861 = vmatprep.subr.mxu0 %v924_v3 }
 0x108   :  { %862 = vmatpush3.msra.mxu0 %v399_v10 }
 0x10f   :  { %v895_v39 = vpop.eup %894 }
 0x110   :  { %v207_v40 = vmul.f32 %v895_v39, %v183_v13 }
 0x111   :  { %v897_v43 = vpop.eup %896 }
 0x112   :  { %v220_v44 = vmul.f32 %v213_v38, %v207_v40  ;;  %v208_v45 = vmul.f32 %v897_v43, %v184_v16  ;;  %v754_v38 = vld [vmem:[%s1351_s8] ss:$0 sm:$0xff] }
 0x113   :  { %v755_v40 = vld [vmem:[%s1352_s9] ss:$0 sm:$0xff] }
 0x114   :  { %v233_v47 = vadd.f32 %v226_v41, %v220_v44  ;;  %v221_v48 = vmul.f32 %v217_v42, %v208_v45 }
 0x116   :  { %v751_v49 = vmul.f32 -1.442695, %v233_v47  ;;  %v234_v50 = vadd.f32 %v230_v46, %v221_v48 }
 0x118   :  { %898 = vpow2.f32 %v751_v49  ;;  %v752_v51 = vmul.f32 -1.442695, %v234_v50  ;;  %v619_v49 = vld [vmem:[%s1354_s14 + $0x38] sm:$0xff]  ;;  %v618_v50 = vld [vmem:[%s1354_s14 + $0x30] sm:$0xff] }
 0x11a   :  { %900 = vpow2.f32 %v752_v51  ;;  %v617_v51 = vld [vmem:[%s1354_s14 + $0x28] sm:$0xff] }
 0x125   :  { %v899_v53 = vpop.eup %898 }
 0x126   :  { %v241_v56 = vadd.f32 1.0, %v899_v53  ;;  %v616_v53 = vld [vmem:[%s1354_s14 + $0x20] sm:$0xff] }
 0x127   :  { %v901_v55 = vpop.eup %900 }
 0x128   :  { %v242_v57 = vadd.f32 1.0, %v901_v55  ;;  %v615_v55 = vld [vmem:[%s1354_s14 + $0x18] sm:$0xff] }
 0x12a   :  { %902 = vrcp.f32 %v242_v57  ;;  %v613_v57 = vld [vmem:[%s1354_s14 + $0x8] sm:$0xff] }
 0x12b   :  { %904 = vrcp.f32 %v241_v56  ;;  %v614_v56 = vld [vmem:[%s1354_s14 + $0x10] sm:$0xff] }
 0x137   :  { %v903_v52 = vpop.eup %902 }
 0x138   :  { %v905_v58 = vpop.eup %904  ;;  %350 = vmatprep.mubr.f32.mxu1 %v903_v52  ;;  %v612_v52 = vld [vmem:[%s1354_s14] sm:$0xff] }
 0x139   :  { %351 = vmatmul.mubr.f32.vlgmr.msra.gmra.mxu1 %v905_v58  ;;  %v757_v58 = vld [vmem:[%s1355_s11] ss:$0 sm:$0xff] }
 0x13a   :  { %870 = vmatprep.mubr.msk.f32.mxu1 %vm925_vm2, %v924_v3  ;;  %867 = vmatpush3.msra.mxu1 %v486_v11 }
 0x13b   :  { %868 = vmatprep.subr.mxu1 %v924_v3 }
 0x13c   :  { %869 = vmatpush3.msra.mxu1 %v485_v12 }
 0x13d   :  { %873 = vmatprep.subr.mxu1 %v924_v3 }
 0x1f9   :  { %v799_v13 = vpop.f32.mrf.mxu1 }
 0x1fb   :  { %v800_v15 = vpop.f32.mrf.mxu1 }
 0x1fc   :  { %v801_v16 = vadd.f32 %v800_v15, %v799_v13 }
 0x1fe   :  { %v353_v17 = vadd.f32 %v801_v16, %v753_v14 }
 0x200   :  { %v358_v18 = vsel %vm165_vm1, %v353_v17, 0.0 }
 0x201   :  { %v359_v19 = vrot.slane %v358_v18, 4 }
 0x203   :  { %v360_v20 = vadd.f32 %v359_v19, %v358_v18  ;;  %v760_v19 = vld [vmem:[%s1357_s13] ss:$0 sm:$0xff] }
 0x205   :  { %v361_v21 = vrot.slane %v360_v20, 2 }
 0x207   :  { %v362_v22 = vadd.f32 %v361_v21, %v360_v20 }
 0x209   :  { %v363_v23 = vrot.slane %v362_v22, 1 }
 0x20b   :  { %v364_v24 = vadd.f32 %v363_v23, %v362_v22 }
 0x20d   :  { %v365_v25 = vmul.f32 0.25, %v364_v24 }
 0x20f   :  { %v366_v26 = vsub.f32 %v353_v17, %v365_v25  ;;  %v759_v17 = vld [vmem:[%s1356_s12] ss:$0 sm:$0xff] }
 0x211   :  { %v367_v27 = vmul.f32 %v366_v26, %v366_v26 }
 0x213   :  { %v368_v28 = vsel %vm165_vm1, %v367_v27, 0.0 }
 0x214   :  { %v369_v29 = vrot.slane %v368_v28, 4 }
 0x216   :  { %v370_v30 = vadd.f32 %v369_v29, %v368_v28 }
 0x218   :  { %v371_v31 = vrot.slane %v370_v30, 2 }
 0x21a   :  { %v372_v32 = vadd.f32 %v371_v31, %v370_v30 }
 0x21c   :  { %v373_v33 = vrot.slane %v372_v32, 1 }
 0x21e   :  { %v374_v34 = vadd.f32 %v373_v33, %v372_v32 }
 0x220   :  { %v375_v35 = vmul.f32 0.25, %v374_v34 }
 0x222   :  { %v376_v36 = vadd.f32 1e-05, %v375_v35 }
 0x224   :  { %906 = vrsqrt.f32 %v376_v36 }
 0x231   :  { %v907_v37 = vpop.eup %906 }
 0x232   :  { %v378_v39 = vmul.f32 %v907_v37, %v366_v26  ;;  %v762_v26 = vld [vmem:[%s1358_s15] ss:$0 sm:$0xff] }
 0x234   :  { %v385_v41 = vmul.f32 %v754_v38, %v378_v39 }
 0x236   :  { %v392_v42 = vadd.f32 %v755_v40, %v385_v41 }
 0x238   :  { %v756_v43 = vmul.f32 -1.442695, %v392_v42 }
 0x23a   :  { %908 = vpow2.f32 %v756_v43 }
 0x247   :  { %v909_v44 = vpop.eup %908 }
 0x248   :  { %v396_v45 = vadd.f32 1.0, %v909_v44 }
 0x24a   :  { %910 = vrcp.f32 %v396_v45 }
 0x257   :  { %v911_v46 = vpop.eup %910 }
 0x258   :  { %864 = vmatmul.mubr.f32.vlgmr.msra.gmra.mxu0 %v911_v46  ;;  %744 = vst [vmem:[%s1353_s18] sm:$0xf] %v911_v46 }
 0x318   :  { %v481_v47 = vpop.f32.mrf.mxu0 }
 0x319   :  { %871 = vmatmul.mubr.msk.f32.vlgmr.msra.gmra.mxu1 %vm494_vm3, %v481_v47 }
 0x31a   :  { %v865_v48 = vpop.f32.mrf.mxu0  ;;  %889 = vmatprep.mubr.msk.f32.mxu1 %vm925_vm2, %v924_v3  ;;  %874 = vmatpush3.msra.mxu1 %v619_v49 }
 0x31b   :  { %875 = vmatprep.subr.mxu1 %v924_v3 }
 0x31c   :  { %876 = vmatpush3.msra.mxu1 %v618_v50  ;;  %v764_v50 = vld [vmem:[%s1359_s16] ss:$0 sm:$0xff] }
 0x31d   :  { %877 = vmatprep.subr.mxu1 %v924_v3 }
 0x31e   :  { %878 = vmatpush3.msra.mxu1 %v617_v51 }
 0x31f   :  { %879 = vmatprep.subr.mxu1 %v924_v3 }
 0x320   :  { %880 = vmatpush3.msra.mxu1 %v616_v53  ;;  %v765_v53 = vld [vmem:[%s1360_s17] ss:$0 sm:$0xff] }
 0x321   :  { %881 = vmatprep.subr.mxu1 %v924_v3 }
 0x322   :  { %882 = vmatpush3.msra.mxu1 %v615_v55 }
 0x323   :  { %883 = vmatprep.subr.mxu1 %v924_v3 }
 0x324   :  { %884 = vmatpush3.msra.mxu1 %v614_v56 }
 0x325   :  { %885 = vmatprep.subr.mxu1 %v924_v3 }
 0x326   :  { %886 = vmatpush3.msra.mxu1 %v613_v57 }
 0x327   :  { %887 = vmatprep.subr.mxu1 %v924_v3 }
 0x328   :  { %888 = vmatpush3.msra.mxu1 %v612_v52 }
 0x3d9   :  { %v564_v54 = vpop.f32.mrf.mxu1 }
 0x3da   :  { %v565_v59 = vadd.f32 %v757_v58, %v564_v54 }
 0x3db   :  { %v872_v60 = vpop.f32.mrf.mxu1 }
 0x3dc   :  { %v571_v61 = vsel %vm570_vm4, %v565_v59, 0.0 }
 0x3dd   :  { %v572_v62 = vrot.slane %v571_v61, 4 }
 0x3df   :  { %v573_v63 = vadd.f32 %v572_v62, %v571_v61 }
 0x3e1   :  { %v574_v0 = vrot.slane %v573_v63, 2 }
 0x3e3   :  { %v575_v1 = vadd.f32 %v574_v0, %v573_v63 }
 0x3e5   :  { %v576_v2 = vrot.slane %v575_v1, 1 }
 0x3e7   :  { %v577_v4 = vadd.f32 %v576_v2, %v575_v1 }
 0x3e9   :  { %v578_v5 = vmul.f32 0.25, %v577_v4 }
 0x3eb   :  { %v579_v6 = vsub.f32 %v565_v59, %v578_v5 }
 0x3ed   :  { %v580_v7 = vmul.f32 %v579_v6, %v579_v6 }
 0x3ef   :  { %v581_v3 = vsel %vm570_vm4, %v580_v7, 0.0 }
 0x3f0   :  { %v582_v8 = vrot.slane %v581_v3, 4 }
 0x3f2   :  { %v583_v9 = vadd.f32 %v582_v8, %v581_v3 }
 0x3f4   :  { %v584_v10 = vrot.slane %v583_v9, 2 }
 0x3f6   :  { %v585_v11 = vadd.f32 %v584_v10, %v583_v9 }
 0x3f8   :  { %v586_v12 = vrot.slane %v585_v11, 1 }
 0x3fa   :  { %v587_v13 = vadd.f32 %v586_v12, %v585_v11 }
 0x3fc   :  { %v588_v14 = vmul.f32 0.25, %v587_v13 }
 0x3fe   :  { %v589_v15 = vadd.f32 1e-05, %v588_v14 }
 0x400   :  { %912 = vrsqrt.f32 %v589_v15 }
 0x40d   :  { %v913_v16 = vpop.eup %912 }
 0x40e   :  { %v591_v18 = vmul.f32 %v913_v16, %v579_v6 }
 0x410   :  { %v598_v20 = vmul.f32 %v759_v17, %v591_v18 }
 0x412   :  { %v605_v21 = vadd.f32 %v760_v19, %v598_v20 }
 0x414   :  { %v761_v22 = vmul.f32 -1.442695, %v605_v21 }
 0x416   :  { %914 = vpow2.f32 %v761_v22 }
 0x423   :  { %v915_v23 = vpop.eup %914 }
 0x424   :  { %v609_v24 = vadd.f32 1.0, %v915_v23 }
 0x426   :  { %916 = vrcp.f32 %v609_v24 }
 0x433   :  { %v917_v25 = vpop.eup %916 }
 0x434   :  { %890 = vmatmul.mubr.msk.f32.vlgmr.msra.gmra.mxu1 %vm88_vm0, %v917_v25 }
 0x4f4   :  { %v696_v27 = vpop.f32.mrf.mxu1 }
 0x4f5   :  { %v697_v28 = vadd.f32 %v762_v26, %v696_v27 }
 0x4f6   :  { %v891_v29 = vpop.f32.mrf.mxu1 }
 0x4f7   :  { %v703_v30 = vsel %vm702_vm5, %v697_v28, 0.0 }
 0x4f8   :  { %v704_v31 = vrot.slane %v703_v30, 4 }
 0x4fa   :  { %v705_v32 = vadd.f32 %v704_v31, %v703_v30 }
 0x4fc   :  { %v706_v33 = vrot.slane %v705_v32, 2 }
 0x4fe   :  { %v707_v34 = vadd.f32 %v706_v33, %v705_v32 }
 0x500   :  { %v708_v35 = vrot.slane %v707_v34, 1 }
 0x502   :  { %v709_v36 = vadd.f32 %v708_v35, %v707_v34 }
 0x504   :  { %v710_v37 = vmul.f32 0.25, %v709_v36 }
 0x506   :  { %v711_v38 = vsub.f32 %v697_v28, %v710_v37 }
 0x508   :  { %v712_v39 = vmul.f32 %v711_v38, %v711_v38 }
 0x50a   :  { %v713_v40 = vsel %vm702_vm5, %v712_v39, 0.0 }
 0x50b   :  { %v714_v41 = vrot.slane %v713_v40, 4 }
 0x50d   :  { %v715_v42 = vadd.f32 %v714_v41, %v713_v40 }
 0x50f   :  { %v716_v43 = vrot.slane %v715_v42, 2 }
 0x511   :  { %v717_v44 = vadd.f32 %v716_v43, %v715_v42 }
 0x513   :  { %v718_v45 = vrot.slane %v717_v44, 1 }
 0x515   :  { %v719_v46 = vadd.f32 %v718_v45, %v717_v44 }
 0x517   :  { %v720_v47 = vmul.f32 0.25, %v719_v46 }
 0x519   :  { %v721_v48 = vadd.f32 1e-05, %v720_v47 }
 0x51b   :  { %918 = vrsqrt.f32 %v721_v48 }
 0x528   :  { %v919_v49 = vpop.eup %918 }
 0x529   :  { %v723_v51 = vmul.f32 %v919_v49, %v711_v38 }
 0x52b   :  { %v730_v55 = vmul.f32 %v764_v50, %v723_v51 }
 0x52d   :  { %v737_v56 = vadd.f32 %v765_v53, %v730_v55 }
 0x52f   :  { %v766_v57 = vmul.f32 -1.442695, %v737_v56 }
 0x531   :  { %920 = vpow2.f32 %v766_v57 }
 0x53e   :  { %v921_v52 = vpop.eup %920 }
 0x53f   :  { %v741_v58 = vadd.f32 1.0, %v921_v52 }
 0x541   :  { %922 = vrcp.f32 %v741_v58 }
 0x54e   :  { %v923_v54 = vpop.eup %922 }
 0x54f   :  { %745 = vst.msk [vmem:[%s1353_s18 + $0x4] sm:$0xf] %vm702_vm5, %v923_v54 }

</bundles_post_ra>
